<compile_context>
chip_gen: v7x
topology: tpu7x:2x2x1
jax: 0.10.0
libtpu: 0.0.40
codegen_flags: <defaults>
</compile_context>

<pallas_src>
import jax
import jax.numpy as jnp
from jax.experimental import pallas as pl
from jax.experimental.pallas import tpu as pltpu


def tiou_loss_kernel(pred_ref, target_ref, out_ref):
    p = pred_ref[...]          # (2, TR, 128) f32 — [left; right] slabs
    t = target_ref[...]        # (2, TR, 128) f32

    mn = jnp.minimum(p, t)     # elementwise, full-width VPU
    mx = jnp.maximum(p, t)

    area_intersect = mn[0] + mn[1]          # (TR, 128)
    area_union = mx[0] + mx[1]              # (TR, 128)

    # -log((ai + 1) / (au + 1)) == log(au + 1) - log(ai + 1): keeps the
    # per-element transcendental work on the EUP slot (no full divide).
    losses = jnp.log(area_union + 1.0) - jnp.log(area_intersect + 1.0)

    # One sublane reduce per (large) block -> lane-dense (1, 128) partial sum.
    out_ref[...] = jnp.sum(losses, axis=0, keepdims=True)


def tiou_loss(pred, target, weight=None, *, tile_n=131072):
    """Pallas TIOU loss.  `weight` is ignored (matches the PyTorch reference,
    whose forward returns losses.sum() unconditionally)."""
    del weight
    n = pred.shape[0]
    assert pred.shape == (n, 2) and target.shape == (n, 2)

    pred = pred.astype(jnp.float32)
    target = target.astype(jnp.float32)

    # ---- choose a lane-dense tile ------------------------------------------
    # A block covers tile_n samples laid out as (2, tile_rows, 128) f32,
    # i.e. 8 * tile_n bytes per input block.
    tile_n = max(1024, (int(tile_n) // 1024) * 1024)    # tile_rows multiple of 8
    n_min = pl.cdiv(max(n, 1), 128) * 128               # smallest lane-dense size
    if n_min <= tile_n:
        tile_n = n_min                                  # whole problem in one step
    n_pad = pl.cdiv(max(n, 1), tile_n) * tile_n

    # Zero padding is exact: padded rows contribute -log((0+1)/(0+1)) = 0.
    if n_pad != n:
        pad = ((0, n_pad - n), (0, 0))
        pred = jnp.pad(pred, pad)
        target = jnp.pad(target, pad)

    rows = n_pad // 128
    tile_rows = tile_n // 128
    num_blocks = rows // tile_rows

    # Lane-dense layout: (N, 2) -> (2, rows, 128); the 128-lane axis carries N.
    pred_t = pred.T.reshape(2, rows, 128)
    target_t = target.T.reshape(2, rows, 128)

    partials = pl.pallas_call(
        tiou_loss_kernel,
        out_shape=jax.ShapeDtypeStruct((num_blocks, 128), jnp.float32),
        grid_spec=pltpu.PrefetchScalarGridSpec(
            num_scalar_prefetch=0,
            grid=(num_blocks,),
            in_specs=[
                pl.BlockSpec((2, tile_rows, 128), lambda i: (0, i, 0)),
                pl.BlockSpec((2, tile_rows, 128), lambda i: (0, i, 0)),
            ],
            out_specs=pl.BlockSpec((1, 128), lambda i: (i, 0)),
        ),
        compiler_params=pltpu.CompilerParams(
            # Each grid step writes its own partial -> independent steps; lets
            # the grid shard across TensorCores on multi-TC chips (v7x).
            dimension_semantics=("parallel",),
            # 2 inputs x 2 buffers x ~1 MiB blocks + output << 32 MiB,
            # safe on v7x's smaller VMEM as well as v5e/v6e.
            vmem_limit_bytes=32 * 1024 * 1024,
        ),
    )(pred_t, target_t)

    return jnp.sum(partials)


def tiou_loss_ref(pred, target):
    pl_, pr = pred[:, 0], pred[:, 1]
    tl, tr = target[:, 0], target[:, 1]
    ai = jnp.minimum(pl_, tl) + jnp.minimum(pr, tr)
    au = jnp.maximum(pl_, tl) + jnp.maximum(pr, tr)
    ious = (ai + 1.0) / (au + 1.0)
    return jnp.sum(-jnp.log(ious))


if __name__ == "__main__":
    key = jax.random.PRNGKey(0)
    k1, k2 = jax.random.split(key)

    # Small, FCOS-like positive left/right regression distances.
    N = 16
    pred = jax.random.uniform(k1, (N, 2), jnp.float32, minval=0.1, maxval=2.0)
    target = jax.random.uniform(k2, (N, 2), jnp.float32, minval=0.1, maxval=2.0)

    loss = tiou_loss(pred, target)
    jax.block_until_ready(loss)
    ref = tiou_loss_ref(pred, target)
    assert jnp.allclose(loss, ref, rtol=1e-5, atol=1e-5), (loss, ref)

    # Exercise the zero-padding path (N not a multiple of 128).
    k3, k4 = jax.random.split(k2)
    N2 = 300
    pred2 = jax.random.uniform(k3, (N2, 2), jnp.float32, minval=0.1, maxval=2.0)
    target2 = jax.random.uniform(k4, (N2, 2), jnp.float32, minval=0.1, maxval=2.0)
    loss2 = tiou_loss(pred2, target2)
    jax.block_until_ready(loss2)
    ref2 = tiou_loss_ref(pred2, target2)
    assert jnp.allclose(loss2, ref2, rtol=1e-5, atol=1e-4), (loss2, ref2)

    print("KERNEL_OK")
</pallas_src>

<mosaic_0001>
module attributes {stable_mosaic.version = 11 : i64} {
  func.func @tiou_loss_kernel(%arg0: i32, %arg1: memref<2x1x128xf32, #tpu.memory_space<vmem>>, %arg2: memref<2x1x128xf32, #tpu.memory_space<vmem>>, %arg3: memref<1x128xf32, #tpu.memory_space<vmem>>) attributes {dimension_semantics = [#tpu.dimension_semantics<parallel>], iteration_bounds = array<i64: 1>, scalar_prefetch = 0 : i64, scratch_operands = 0 : i64, tpu.core_type = #tpu.core_type<tc>, window_params = [{transform_indices = @transform_0, window_bounds = array<i64: 2, 1, 128>}, {transform_indices = @transform_1, window_bounds = array<i64: 2, 1, 128>}, {transform_indices = @transform_2, window_bounds = array<i64: 1, 128>}]} {
    %c0 = arith.constant 0 : index
    %c0_0 = arith.constant 0 : index
    %c0_1 = arith.constant 0 : index
    %0 = vector.load %arg1[%c0, %c0_0, %c0_1] : memref<2x1x128xf32, #tpu.memory_space<vmem>>, vector<2x1x128xf32>
    %c0_2 = arith.constant 0 : index
    %c0_3 = arith.constant 0 : index
    %c0_4 = arith.constant 0 : index
    %1 = vector.load %arg2[%c0_2, %c0_3, %c0_4] : memref<2x1x128xf32, #tpu.memory_space<vmem>>, vector<2x1x128xf32>
    %2 = arith.minimumf %0, %1 : vector<2x1x128xf32>
    %3 = arith.maximumf %0, %1 : vector<2x1x128xf32>
    %4 = vector.extract_strided_slice %2 {offsets = [0, 0, 0], sizes = [1, 1, 128], strides = [1, 1, 1]} : vector<2x1x128xf32> to vector<1x1x128xf32>
    %5 = vector.shape_cast %4 : vector<1x1x128xf32> to vector<1x128xf32>
    %6 = vector.extract_strided_slice %2 {offsets = [1, 0, 0], sizes = [1, 1, 128], strides = [1, 1, 1]} : vector<2x1x128xf32> to vector<1x1x128xf32>
    %7 = vector.shape_cast %6 : vector<1x1x128xf32> to vector<1x128xf32>
    %8 = arith.addf %5, %7 : vector<1x128xf32>
    %9 = vector.extract_strided_slice %3 {offsets = [0, 0, 0], sizes = [1, 1, 128], strides = [1, 1, 1]} : vector<2x1x128xf32> to vector<1x1x128xf32>
    %10 = vector.shape_cast %9 : vector<1x1x128xf32> to vector<1x128xf32>
    %11 = vector.extract_strided_slice %3 {offsets = [1, 0, 0], sizes = [1, 1, 128], strides = [1, 1, 1]} : vector<2x1x128xf32> to vector<1x1x128xf32>
    %12 = vector.shape_cast %11 : vector<1x1x128xf32> to vector<1x128xf32>
    %13 = arith.addf %10, %12 : vector<1x128xf32>
    %cst = arith.constant 1.000000e+00 : f32
    %14 = vector.broadcast %cst : f32 to vector<1x128xf32>
    %15 = arith.addf %13, %14 : vector<1x128xf32>
    %16 = math.log %15 : vector<1x128xf32>
    %cst_5 = arith.constant 1.000000e+00 : f32
    %17 = vector.broadcast %cst_5 : f32 to vector<1x128xf32>
    %18 = arith.addf %8, %17 : vector<1x128xf32>
    %19 = math.log %18 : vector<1x128xf32>
    %20 = arith.subf %16, %19 : vector<1x128xf32>
    %cst_6 = arith.constant dense<0.000000e+00> : vector<128xf32>
    %21 = vector.multi_reduction <add>, %20, %cst_6 [0] : vector<1x128xf32> to vector<128xf32>
    %22 = vector.shape_cast %21 : vector<128xf32> to vector<1x128xf32>
    %c0_7 = arith.constant 0 : index
    %c0_8 = arith.constant 0 : index
    %23 = vector.load %arg3[%c0_7, %c0_8] : memref<1x128xf32, #tpu.memory_space<vmem>>, vector<1x128xf32>
    tpu.vector_store %arg3[%c0_7, %c0_8], %22 {strides = array<i32>} : memref<1x128xf32, #tpu.memory_space<vmem>>, vector<1x128xf32>,
    return
  }
  func.func @transform_0(%arg0: i32) -> (i32, i32, i32) {
    %c0_i32 = arith.constant 0 : i32
    %c0_i32_0 = arith.constant 0 : i32
    %c0_i32_1 = arith.constant 0 : i32
    return %c0_i32, %arg0, %c0_i32_0 : i32, i32, i32
  }
  func.func @transform_1(%arg0: i32) -> (i32, i32, i32) {
    %c0_i32 = arith.constant 0 : i32
    %c0_i32_0 = arith.constant 0 : i32
    %c0_i32_1 = arith.constant 0 : i32
    return %c0_i32, %arg0, %c0_i32_0 : i32, i32, i32
  }
  func.func @transform_2(%arg0: i32) -> (i32, i32) {
    %c0_i32 = arith.constant 0 : i32
    %c0_i32_0 = arith.constant 0 : i32
    return %arg0, %c0_i32 : i32, i32
  }
}

</mosaic_0001>

<bundles_post_ra>
// kernel: tpu_custom_call.1
= control target key start
LH: loop header
LB: loop body
LE: loop exit
PB: predicated region body
PF: predicated region fallthrough
CT: control target
= control target key end

     0   :  { %7 = vsyncpa [#allocation3], 0  ;;  %s165_s0 = inlined_call_operand.hbm [shape: f32[2,1,128], index: 0, kind: input, shape index: {}]   ;;  %s166_s1 = inlined_call_operand.vmem [shape: f32[2,1,128], index: 1, kind: input, shape index: {}]   ;;  %s167_s2 = inlined_call_operand.hbm [shape: f32[1,128], index: 2, kind: output, shape index: {}]  }
   0x1   :  { %8 = vsyncpa [#allocation4], 0  ;;  %s116_s9 = smov [#allocation2]   ;;  %s68_s13 = scalar_lea.hbm %s165_s0, 32 }
   0x2   :  { %s14_s10 = sshll.u32 %s116_s9, 4  ;;  %p69_p0 = scmp.ne.s32.totalorder %s165_s0, %s68_s13  ;;  %s15_s10 = int_to_ptr.vmem [resolvable:$true] %s14_s10 }
   0x3   :  { %p72_p1 = scmp.lt.u32.totalorder %s68_s13, %s165_s0 }
   0x5   :  { %p74_p2 = pnand %p72_p1, %p69_p0 }
   0x7   :  { %77 = shalt.err (!%p74_p2)
}
   0x8   :  { %s78_s18 = scalar_lea.vmem %s15_s10, 32  ;;  %p83_p4 = scmp.lt.s32.totalorder %s15_s10, %s15_s10 }
   0x9   :  { %p79_p3 = scmp.ne.s32.totalorder %s15_s10, %s78_s18  ;;  %p84_p5 = scmp.lt.s32.totalorder %s78_s18, %s78_s18 }
   0xb   :  { %p85_p6 = por %p84_p5, %p83_p4 }
   0xd   :  { %p86_p7 = pnand %p85_p6, %p79_p3 }
   0xf   :  { %89 = shalt.err (!%p86_p7)
}
  0x10   :  { %s117_s19 = smov 16   ;;  %s118_s20 = smov 1  }
  0x11   :  { %20 = dma.hbm_to_vmem [thread:$0]  %s165_s0, 32, %s15_s10, [#allocation3], %s117_s19, %s117_s19, %s118_s20  }
  0x12   :  { %112 = dma.done.wait [#allocation3], 32  }
  0x13   :  { %113 = vsyncadd [#allocation3], 4294967264  ;;  %v26_v0 = vld [vmem:[#allocation2] sm:$0x1]  ;;  %v27_v1 = vld [vmem:[#allocation2 + $0x1] sm:$0x1] }
  0x14   :  { %v28_v2 = vld [vmem:[%s166_s1] sm:$0x1]  ;;  %v29_v3 = vld [vmem:[%s166_s1 + $0x1] sm:$0x1]  ;;  %s119_s0 = smov [#allocation5]  }
  0x15   :  { %v30_v4 = vmin.f32 %v26_v0, %v28_v2  ;;  %v32_v5 = vmax.f32 %v26_v0, %v28_v2  ;;  %v31_v6 = vmin.f32 %v27_v1, %v29_v3  ;;  %v33_v7 = vmax.f32 %v27_v1, %v29_v3  ;;  %s51_s27 = sshll.u32 %s119_s0, 4  ;;  %s52_s27 = int_to_ptr.vmem [resolvable:$true] %s51_s27 }
  0x16   :  { %s90_s1 = scalar_lea.vmem %s52_s27, 16  ;;  %s94_s28 = scalar_lea.vmem %s52_s27, 32 }
  0x17   :  { %v34_v8 = vadd.f32 %v31_v6, %v30_v4  ;;  %v35_v9 = vadd.f32 %v33_v7, %v32_v5  ;;  %p91_p8 = scmp.ne.s32.totalorder %s52_s27, %s90_s1  ;;  %p95_p9 = scmp.lt.s32.totalorder %s52_s27, %s52_s27 }
  0x18   :  { %p96_p10 = scmp.lt.s32.totalorder %s94_s28, %s90_s1 }
  0x19   :  { %v36_v10 = vadd.f32 1.0, %v35_v9  ;;  %v39_v11 = vadd.f32 1.0, %v34_v8 }
  0x1a   :  { %p97_p11 = por %p96_p10, %p95_p9 }
  0x1b   :  { %64 = vlog2.f32 %v36_v10 }
  0x1c   :  { %66 = vlog2.f32 %v39_v11  ;;  %p98_p12 = pnand %p97_p11, %p91_p8 }
  0x25   :  { %v65_v12 = vpop.eup %64 }
  0x26   :  { %v67_v13 = vpop.eup %66  ;;  %v38_v14 = vmul.f32 0.6931472, %v65_v12 }
  0x27   :  { %v41_v15 = vmul.f32 0.6931472, %v67_v13 }
  0x29   :  { %v42_v16 = vsub.f32 %v38_v14, %v41_v15 }
  0x2b   :  { %44 = vst [vmem:[#allocation5] sm:$0x1] %v42_v16 }
  0x2c   :  { %101 = shalt.err (!%p98_p12)
}
  0x2d   :  { %s102_s3 = scalar_lea.hbm %s167_s2, 16 }
  0x2e   :  { %p103_p13 = scmp.ne.s32.totalorder %s167_s2, %s102_s3  ;;  %p106_p0 = scmp.lt.u32.totalorder %s102_s3, %s167_s2 }
  0x30   :  { %p108_p1 = pnand %p106_p0, %p103_p13 }
  0x32   :  { %111 = shalt.err (!%p108_p1)
}
  0x33   :  { %54 = dma.vmem_to_hbm [thread:$0]  %s52_s27, 16, %s167_s2, [#allocation4]  }
  0x34   :  { %114 = dma.done.wait [#allocation4], 16  }
  0x35   :  { %115 = vsyncadd [#allocation4], 4294967280 }
  0x36   :  { %58 = vsyncpa [#allocation3], 1 }
  0x37   :  { %59 = vsyncpa [#allocation4], 1 }

</bundles_post_ra>
